<compile_context>
chip_gen: v6e
topology: v6e:2x2x1
jax: 0.10.0
libtpu: 0.0.40
codegen_flags: <defaults>
</compile_context>

<pallas_src>
import functools

import jax
import jax.numpy as jnp
from jax.experimental import pallas as pl
from jax.experimental.pallas import tpu as pltpu


def _pair(v):
    return (v, v) if isinstance(v, int) else tuple(v)


def _make_kernel(T, KW, Wp, P):
    """Build the kernel closure over the static conv geometry."""

    def kernel(x_ref, w_ref, b_ref, out_ref, acc_ref):
        # x_ref:   (1, c_tile, L)      flattened padded input channels block
        # w_ref:   (T, Cout, c_tile)   normalized weights, per-tap slices
        # b_ref:   (Cout, 1)           bias (f32)
        # out_ref: (1, Cout, P)        flat extended output (lane-dense)
        # acc_ref: (Cout, P) f32       persistent accumulator across Cin blocks
        c = pl.program_id(1)

        @pl.when(c == 0)
        def _():
            acc_ref[...] = jnp.zeros_like(acc_ref)

        acc = acc_ref[...]
        # Static unrolled tap loop: each tap is a contiguous, statically-offset
        # slab of the flat spatial axis -> one small MXU matmul, accumulated in f32.
        for t in range(T):
            kh, kw = divmod(t, KW)
            off = kh * Wp + kw
            slab = x_ref[0, :, pl.ds(off, P)]               # (c_tile, P)
            acc = acc + jnp.dot(w_ref[t], slab,
                                preferred_element_type=jnp.float32)
        acc_ref[...] = acc

        @pl.when(c == pl.num_programs(1) - 1)
        def _():
            out_ref[0] = (acc_ref[...] + b_ref[...]).astype(out_ref.dtype)

    return kernel


def weight_norm_conv2d(x, weight_v, weight_g, bias, *, stride=1, padding=0,
                       max_cin_tile=256):
    """Forward pass of WeightNormConv2d (PyTorch semantics).

    x:        (N, Cin, H, W)       NCHW
    weight_v: (Cout, Cin, KH, KW)  weight_norm 'v'
    weight_g: (Cout, 1, 1, 1)      weight_norm 'g'
    bias:     (Cout,)
    """
    sh, sw = _pair(stride)
    ph, pw = _pair(padding)
    N, Cin, H, W = x.shape
    Cout, _, KH, KW = weight_v.shape
    Hp, Wp = H + 2 * ph, W + 2 * pw
    OH = (Hp - KH) // sh + 1
    OW = (Wp - KW) // sw + 1
    OHf = Hp - KH + 1            # stride-1 ("full") output rows computed in-kernel
    P = OHf * Wp                 # flat extended output length per (n, cout)
    T = KH * KW

    # ---- weight norm: computed once, in f32 (matches torch weight_norm) ----
    v = weight_v.astype(jnp.float32)
    norm = jnp.sqrt(jnp.sum(v * v, axis=(1, 2, 3), keepdims=True))   # (Cout,1,1,1)
    w = weight_g.astype(jnp.float32) * v / norm                      # (Cout,Cin,KH,KW)
    w_taps = w.transpose(2, 3, 0, 1).reshape(T, Cout, Cin)           # (T, Cout, Cin)

    # ---- channel (contraction) tiling --------------------------------------
    if Cin <= max_cin_tile:
        c_tile, Cin_pad = Cin, Cin
    else:
        c_tile = max_cin_tile
        Cin_pad = ((Cin + c_tile - 1) // c_tile) * c_tile

    # ---- input prep: spatial pad (one extra zero row at the bottom supplies
    #      the flat-axis tail slack for the right-most taps), flatten spatial.
    #      Stays channel-major -> no input transpose at all. -------------------
    xp = jnp.pad(x, ((0, 0), (0, 0), (ph, ph + 1), (pw, pw)))
    L = (Hp + 1) * Wp
    xflat = xp.reshape(N, Cin, L)
    if Cin_pad != Cin:
        xflat = jnp.pad(xflat, ((0, 0), (0, Cin_pad - Cin), (0, 0)))
        w_taps = jnp.pad(w_taps, ((0, 0), (0, 0), (0, Cin_pad - Cin)))
    w_taps = w_taps.astype(x.dtype)                  # bf16 inputs -> bf16 MXU path
    b_col = bias.reshape(Cout, 1).astype(jnp.float32)

    n_c = Cin_pad // c_tile

    # ---- explicit VMEM budget (double-buffered in/out + weights + scratch) --
    itemsize = jnp.dtype(x.dtype).itemsize
    vmem_need = (2 * (c_tile * L + Cout * P) * itemsize
                 + T * Cout * Cin_pad * itemsize
                 + Cout * P * 4
                 + (2 << 20))
    vmem_limit = int(min(max(vmem_need, 32 * 1024 * 1024), 64 * 1024 * 1024))

    out_ext = pl.pallas_call(
        _make_kernel(T, KW, Wp, P),
        out_shape=jax.ShapeDtypeStruct((N, Cout, P), x.dtype),
        grid_spec=pltpu.PrefetchScalarGridSpec(
            num_scalar_prefetch=0,
            grid=(N, n_c),
            in_specs=[
                pl.BlockSpec((1, c_tile, L), lambda n, c: (n, c, 0)),      # input
                pl.BlockSpec((T, Cout, c_tile), lambda n, c: (0, 0, c)),   # weights
                pl.BlockSpec((Cout, 1), lambda n, c: (0, 0)),              # bias
            ],
            out_specs=pl.BlockSpec((1, Cout, P), lambda n, c: (n, 0, 0)),
            scratch_shapes=[pltpu.VMEM((Cout, P), jnp.float32)],
        ),
        compiler_params=pltpu.CompilerParams(
            dimension_semantics=("parallel", "arbitrary"),
            vmem_limit_bytes=vmem_limit),
    )(xflat, w_taps, b_col)

    # (N, Cout, OHf, Wp) -> strided crop to (N, Cout, OH, OW); already NCHW,
    # so no transpose is needed.
    out_ext = out_ext.reshape(N, Cout, OHf, Wp)
    out = jax.lax.slice(out_ext, (0, 0, 0, 0),
                        (N, Cout, (OH - 1) * sh + 1, (OW - 1) * sw + 1),
                        (1, 1, sh, sw))
    return out


def _reference(x, weight_v, weight_g, bias, *, stride, padding):
    """Pure-JAX reference (mirrors torch weight_norm + F.conv2d)."""
    sh, sw = _pair(stride)
    ph, pw = _pair(padding)
    norm = jnp.sqrt(jnp.sum(weight_v ** 2, axis=(1, 2, 3), keepdims=True))
    w = weight_g * weight_v / norm
    out = jax.lax.conv_general_dilated(
        x, w, window_strides=(sh, sw),
        padding=[(ph, ph), (pw, pw)],
        dimension_numbers=("NCHW", "OIHW", "NCHW"))
    return out + bias.reshape(1, -1, 1, 1)


if __name__ == "__main__":
    # Module config: in_channels=4, out_channels=8, kernel_size=3, stride=1,
    # padding=1, bias=True.
    N, Cin, H, W = 2, 4, 16, 16
    Cout, KH, KW = 8, 3, 3
    stride = (1, 1)
    padding = (1, 1)

    key = jax.random.PRNGKey(0)
    kx, kv, kg, kb = jax.random.split(key, 4)
    x = jax.random.normal(kx, (N, Cin, H, W), dtype=jnp.float32)
    weight_v = jax.random.normal(kv, (Cout, Cin, KH, KW), dtype=jnp.float32) * 0.1
    weight_g = jax.random.normal(kg, (Cout, 1, 1, 1), dtype=jnp.float32) + 1.0
    bias = jax.random.normal(kb, (Cout,), dtype=jnp.float32) * 0.1

    fwd = jax.jit(functools.partial(weight_norm_conv2d,
                                    stride=stride, padding=padding))
    out = jax.block_until_ready(fwd(x, weight_v, weight_g, bias))

    ref = _reference(x, weight_v, weight_g, bias, stride=stride, padding=padding)
    assert out.shape == (N, Cout, H, W), out.shape
    assert jnp.allclose(out, ref, atol=1e-4, rtol=1e-4), "mismatch vs reference"

    print("KERNEL_OK")
</pallas_src>

<mosaic_0001>
module attributes {stable_mosaic.version = 11 : i64} {
  func.func @kernel(%arg0: i32, %arg1: i32, %arg2: memref<1x4x342xf32, #tpu.memory_space<vmem>>, %arg3: memref<9x8x4xf32, #tpu.memory_space<vmem>>, %arg4: memref<8x1xf32, #tpu.memory_space<vmem>>, %arg5: memref<1x8x288xf32, #tpu.memory_space<vmem>>, %arg6: memref<8x288xf32, #tpu.memory_space<vmem>>) attributes {dimension_semantics = [#tpu.dimension_semantics<parallel>, #tpu.dimension_semantics<arbitrary>], iteration_bounds = array<i64: 2, 1>, scalar_prefetch = 0 : i64, scratch_operands = 1 : i64, tpu.core_type = #tpu.core_type<tc>, window_params = [{transform_indices = @transform_0, window_bounds = array<i64: 1, 4, 342>}, {transform_indices = @transform_1, window_bounds = array<i64: 9, 8, 4>}, {pipeline_mode = #tpu.pipeline_mode<synchronous>, transform_indices = @transform_2, window_bounds = array<i64: 8, 1>}, {transform_indices = @transform_3, window_bounds = array<i64: 1, 8, 288>}]} {
    %c0_i32 = arith.constant 0 : i32
    %0 = arith.cmpi eq, %arg1, %c0_i32 : i32
    %1 = arith.extui %0 : i1 to i32
    %c0_i32_0 = arith.constant 0 : i32
    %2 = arith.cmpi ne, %1, %c0_i32_0 : i32
    scf.if %2 {
      %cst_54 = arith.constant 0.000000e+00 : f32
      %62 = vector.broadcast %cst_54 : f32 to vector<8x288xf32>
      %c0_55 = arith.constant 0 : index
      %c0_56 = arith.constant 0 : index
      %63 = vector.load %arg6[%c0_55, %c0_56] : memref<8x288xf32, #tpu.memory_space<vmem>>, vector<8x288xf32>
      tpu.vector_store %arg6[%c0_55, %c0_56], %62 {strides = array<i32>} : memref<8x288xf32, #tpu.memory_space<vmem>>, vector<8x288xf32>,
    } else {
    }
    %c0 = arith.constant 0 : index
    %c0_1 = arith.constant 0 : index
    %3 = vector.load %arg6[%c0, %c0_1] : memref<8x288xf32, #tpu.memory_space<vmem>>, vector<8x288xf32>
    %c0_2 = arith.constant 0 : index
    %c0_3 = arith.constant 0 : index
    %c0_4 = arith.constant 0 : index
    %4 = vector.load %arg2[%c0_2, %c0_3, %c0_4] : memref<1x4x342xf32, #tpu.memory_space<vmem>>, vector<1x4x288xf32>
    %5 = vector.shape_cast %4 : vector<1x4x288xf32> to vector<4x288xf32>
    %c0_5 = arith.constant 0 : index
    %c0_6 = arith.constant 0 : index
    %c0_7 = arith.constant 0 : index
    %6 = vector.load %arg3[%c0_5, %c0_6, %c0_7] : memref<9x8x4xf32, #tpu.memory_space<vmem>>, vector<1x8x4xf32>
    %7 = vector.shape_cast %6 : vector<1x8x4xf32> to vector<8x4xf32>
    %cst = arith.constant dense<0.000000e+00> : vector<8x288xf32>
    %8 = tpu.matmul %7, %5, %cst {dimension_numbers = #tpu.dot_dimension_numbers<[1], [0], [0], [1], [0, 0, 1, 1], [], []>} : vector<8x4xf32>, vector<4x288xf32>, vector<8x288xf32> -> vector<8x288xf32>
    %9 = arith.addf %3, %8 : vector<8x288xf32>
    %c0_8 = arith.constant 0 : index
    %c0_9 = arith.constant 0 : index
    %c1 = arith.constant 1 : index
    %10 = vector.load %arg2[%c0_8, %c0_9, %c1] : memref<1x4x342xf32, #tpu.memory_space<vmem>>, vector<1x4x288xf32>
    %11 = vector.shape_cast %10 : vector<1x4x288xf32> to vector<4x288xf32>
    %c1_10 = arith.constant 1 : index
    %c0_11 = arith.constant 0 : index
    %c0_12 = arith.constant 0 : index
    %12 = vector.load %arg3[%c1_10, %c0_11, %c0_12] : memref<9x8x4xf32, #tpu.memory_space<vmem>>, vector<1x8x4xf32>
    %13 = vector.shape_cast %12 : vector<1x8x4xf32> to vector<8x4xf32>
    %cst_13 = arith.constant dense<0.000000e+00> : vector<8x288xf32>
    %14 = tpu.matmul %13, %11, %cst_13 {dimension_numbers = #tpu.dot_dimension_numbers<[1], [0], [0], [1], [0, 0, 1, 1], [], []>} : vector<8x4xf32>, vector<4x288xf32>, vector<8x288xf32> -> vector<8x288xf32>
    %15 = arith.addf %9, %14 : vector<8x288xf32>
    %c0_14 = arith.constant 0 : index
    %c0_15 = arith.constant 0 : index
    %c2 = arith.constant 2 : index
    %16 = vector.load %arg2[%c0_14, %c0_15, %c2] : memref<1x4x342xf32, #tpu.memory_space<vmem>>, vector<1x4x288xf32>
    %17 = vector.shape_cast %16 : vector<1x4x288xf32> to vector<4x288xf32>
    %c2_16 = arith.constant 2 : index
    %c0_17 = arith.constant 0 : index
    %c0_18 = arith.constant 0 : index
    %18 = vector.load %arg3[%c2_16, %c0_17, %c0_18] : memref<9x8x4xf32, #tpu.memory_space<vmem>>, vector<1x8x4xf32>
    %19 = vector.shape_cast %18 : vector<1x8x4xf32> to vector<8x4xf32>
    %cst_19 = arith.constant dense<0.000000e+00> : vector<8x288xf32>
    %20 = tpu.matmul %19, %17, %cst_19 {dimension_numbers = #tpu.dot_dimension_numbers<[1], [0], [0], [1], [0, 0, 1, 1], [], []>} : vector<8x4xf32>, vector<4x288xf32>, vector<8x288xf32> -> vector<8x288xf32>
    %21 = arith.addf %15, %20 : vector<8x288xf32>
    %c0_20 = arith.constant 0 : index
    %c0_21 = arith.constant 0 : index
    %c18 = arith.constant 18 : index
    %22 = vector.load %arg2[%c0_20, %c0_21, %c18] : memref<1x4x342xf32, #tpu.memory_space<vmem>>, vector<1x4x288xf32>
    %23 = vector.shape_cast %22 : vector<1x4x288xf32> to vector<4x288xf32>
    %c3 = arith.constant 3 : index
    %c0_22 = arith.constant 0 : index
    %c0_23 = arith.constant 0 : index
    %24 = vector.load %arg3[%c3, %c0_22, %c0_23] : memref<9x8x4xf32, #tpu.memory_space<vmem>>, vector<1x8x4xf32>
    %25 = vector.shape_cast %24 : vector<1x8x4xf32> to vector<8x4xf32>
    %cst_24 = arith.constant dense<0.000000e+00> : vector<8x288xf32>
    %26 = tpu.matmul %25, %23, %cst_24 {dimension_numbers = #tpu.dot_dimension_numbers<[1], [0], [0], [1], [0, 0, 1, 1], [], []>} : vector<8x4xf32>, vector<4x288xf32>, vector<8x288xf32> -> vector<8x288xf32>
    %27 = arith.addf %21, %26 : vector<8x288xf32>
    %c0_25 = arith.constant 0 : index
    %c0_26 = arith.constant 0 : index
    %c19 = arith.constant 19 : index
    %28 = vector.load %arg2[%c0_25, %c0_26, %c19] : memref<1x4x342xf32, #tpu.memory_space<vmem>>, vector<1x4x288xf32>
    %29 = vector.shape_cast %28 : vector<1x4x288xf32> to vector<4x288xf32>
    %c4 = arith.constant 4 : index
    %c0_27 = arith.constant 0 : index
    %c0_28 = arith.constant 0 : index
    %30 = vector.load %arg3[%c4, %c0_27, %c0_28] : memref<9x8x4xf32, #tpu.memory_space<vmem>>, vector<1x8x4xf32>
    %31 = vector.shape_cast %30 : vector<1x8x4xf32> to vector<8x4xf32>
    %cst_29 = arith.constant dense<0.000000e+00> : vector<8x288xf32>
    %32 = tpu.matmul %31, %29, %cst_29 {dimension_numbers = #tpu.dot_dimension_numbers<[1], [0], [0], [1], [0, 0, 1, 1], [], []>} : vector<8x4xf32>, vector<4x288xf32>, vector<8x288xf32> -> vector<8x288xf32>
    %33 = arith.addf %27, %32 : vector<8x288xf32>
    %c0_30 = arith.constant 0 : index
    %c0_31 = arith.constant 0 : index
    %c20 = arith.constant 20 : index
    %34 = vector.load %arg2[%c0_30, %c0_31, %c20] : memref<1x4x342xf32, #tpu.memory_space<vmem>>, vector<1x4x288xf32>
    %35 = vector.shape_cast %34 : vector<1x4x288xf32> to vector<4x288xf32>
    %c5 = arith.constant 5 : index
    %c0_32 = arith.constant 0 : index
    %c0_33 = arith.constant 0 : index
    %36 = vector.load %arg3[%c5, %c0_32, %c0_33] : memref<9x8x4xf32, #tpu.memory_space<vmem>>, vector<1x8x4xf32>
    %37 = vector.shape_cast %36 : vector<1x8x4xf32> to vector<8x4xf32>
    %cst_34 = arith.constant dense<0.000000e+00> : vector<8x288xf32>
    %38 = tpu.matmul %37, %35, %cst_34 {dimension_numbers = #tpu.dot_dimension_numbers<[1], [0], [0], [1], [0, 0, 1, 1], [], []>} : vector<8x4xf32>, vector<4x288xf32>, vector<8x288xf32> -> vector<8x288xf32>
    %39 = arith.addf %33, %38 : vector<8x288xf32>
    %c0_35 = arith.constant 0 : index
    %c0_36 = arith.constant 0 : index
    %c36 = arith.constant 36 : index
    %40 = vector.load %arg2[%c0_35, %c0_36, %c36] : memref<1x4x342xf32, #tpu.memory_space<vmem>>, vector<1x4x288xf32>
    %41 = vector.shape_cast %40 : vector<1x4x288xf32> to vector<4x288xf32>
    %c6 = arith.constant 6 : index
    %c0_37 = arith.constant 0 : index
    %c0_38 = arith.constant 0 : index
    %42 = vector.load %arg3[%c6, %c0_37, %c0_38] : memref<9x8x4xf32, #tpu.memory_space<vmem>>, vector<1x8x4xf32>
    %43 = vector.shape_cast %42 : vector<1x8x4xf32> to vector<8x4xf32>
    %cst_39 = arith.constant dense<0.000000e+00> : vector<8x288xf32>
    %44 = tpu.matmul %43, %41, %cst_39 {dimension_numbers = #tpu.dot_dimension_numbers<[1], [0], [0], [1], [0, 0, 1, 1], [], []>} : vector<8x4xf32>, vector<4x288xf32>, vector<8x288xf32> -> vector<8x288xf32>
    %45 = arith.addf %39, %44 : vector<8x288xf32>
    %c0_40 = arith.constant 0 : index
    %c0_41 = arith.constant 0 : index
    %c37 = arith.constant 37 : index
    %46 = vector.load %arg2[%c0_40, %c0_41, %c37] : memref<1x4x342xf32, #tpu.memory_space<vmem>>, vector<1x4x288xf32>
    %47 = vector.shape_cast %46 : vector<1x4x288xf32> to vector<4x288xf32>
    %c7 = arith.constant 7 : index
    %c0_42 = arith.constant 0 : index
    %c0_43 = arith.constant 0 : index
    %48 = vector.load %arg3[%c7, %c0_42, %c0_43] : memref<9x8x4xf32, #tpu.memory_space<vmem>>, vector<1x8x4xf32>
    %49 = vector.shape_cast %48 : vector<1x8x4xf32> to vector<8x4xf32>
    %cst_44 = arith.constant dense<0.000000e+00> : vector<8x288xf32>
    %50 = tpu.matmul %49, %47, %cst_44 {dimension_numbers = #tpu.dot_dimension_numbers<[1], [0], [0], [1], [0, 0, 1, 1], [], []>} : vector<8x4xf32>, vector<4x288xf32>, vector<8x288xf32> -> vector<8x288xf32>
    %51 = arith.addf %45, %50 : vector<8x288xf32>
    %c0_45 = arith.constant 0 : index
    %c0_46 = arith.constant 0 : index
    %c38 = arith.constant 38 : index
    %52 = vector.load %arg2[%c0_45, %c0_46, %c38] : memref<1x4x342xf32, #tpu.memory_space<vmem>>, vector<1x4x288xf32>
    %53 = vector.shape_cast %52 : vector<1x4x288xf32> to vector<4x288xf32>
    %c8 = arith.constant 8 : index
    %c0_47 = arith.constant 0 : index
    %c0_48 = arith.constant 0 : index
    %54 = vector.load %arg3[%c8, %c0_47, %c0_48] : memref<9x8x4xf32, #tpu.memory_space<vmem>>, vector<1x8x4xf32>
    %55 = vector.shape_cast %54 : vector<1x8x4xf32> to vector<8x4xf32>
    %cst_49 = arith.constant dense<0.000000e+00> : vector<8x288xf32>
    %56 = tpu.matmul %55, %53, %cst_49 {dimension_numbers = #tpu.dot_dimension_numbers<[1], [0], [0], [1], [0, 0, 1, 1], [], []>} : vector<8x4xf32>, vector<4x288xf32>, vector<8x288xf32> -> vector<8x288xf32>
    %57 = arith.addf %51, %56 : vector<8x288xf32>
    %c0_50 = arith.constant 0 : index
    %c0_51 = arith.constant 0 : index
    %58 = vector.load %arg6[%c0_50, %c0_51] : memref<8x288xf32, #tpu.memory_space<vmem>>, vector<8x288xf32>
    tpu.vector_store %arg6[%c0_50, %c0_51], %57 {strides = array<i32>} : memref<8x288xf32, #tpu.memory_space<vmem>>, vector<8x288xf32>,
    %c0_i32_52 = arith.constant 0 : i32
    %59 = arith.cmpi eq, %arg1, %c0_i32_52 : i32
    %60 = arith.extui %59 : i1 to i32
    %c0_i32_53 = arith.constant 0 : i32
    %61 = arith.cmpi ne, %60, %c0_i32_53 : i32
    scf.if %61 {
      %c0_54 = arith.constant 0 : index
      %c0_55 = arith.constant 0 : index
      %62 = vector.load %arg6[%c0_54, %c0_55] : memref<8x288xf32, #tpu.memory_space<vmem>>, vector<8x288xf32>
      %c0_56 = arith.constant 0 : index
      %c0_57 = arith.constant 0 : index
      %63 = vector.load %arg4[%c0_56, %c0_57] : memref<8x1xf32, #tpu.memory_space<vmem>>, vector<8x1xf32>
      %64 = vector.broadcast %63 : vector<8x1xf32> to vector<8x288xf32>
      %65 = arith.addf %62, %64 : vector<8x288xf32>
      %c0_58 = arith.constant 0 : index
      %c0_59 = arith.constant 0 : index
      %c0_60 = arith.constant 0 : index
      %66 = vector.load %arg5[%c0_58, %c0_59, %c0_60] : memref<1x8x288xf32, #tpu.memory_space<vmem>>, vector<1x8x288xf32>
      %67 = vector.shape_cast %66 : vector<1x8x288xf32> to vector<8x288xf32>
      %68 = vector.shape_cast %65 : vector<8x288xf32> to vector<1x8x288xf32>
      tpu.vector_store %arg5[%c0_58, %c0_59, %c0_60], %68 {strides = array<i32>} : memref<1x8x288xf32, #tpu.memory_space<vmem>>, vector<1x8x288xf32>,
    } else {
    }
    return
  }
  func.func @transform_0(%arg0: i32, %arg1: i32) -> (i32, i32, i32) {
    %c0_i32 = arith.constant 0 : i32
    %c0_i32_0 = arith.constant 0 : i32
    return %arg0, %arg1, %c0_i32 : i32, i32, i32
  }
  func.func @transform_1(%arg0: i32, %arg1: i32) -> (i32, i32, i32) {
    %c0_i32 = arith.constant 0 : i32
    %c0_i32_0 = arith.constant 0 : i32
    %c0_i32_1 = arith.constant 0 : i32
    return %c0_i32, %c0_i32_0, %arg1 : i32, i32, i32
  }
  func.func @transform_2(%arg0: i32, %arg1: i32) -> (i32, i32) {
    %c0_i32 = arith.constant 0 : i32
    %c0_i32_0 = arith.constant 0 : i32
    %c0_i32_1 = arith.constant 0 : i32
    return %c0_i32, %c0_i32_0 : i32, i32
  }
  func.func @transform_3(%arg0: i32, %arg1: i32) -> (i32, i32, i32) {
    %c0_i32 = arith.constant 0 : i32
    %c0_i32_0 = arith.constant 0 : i32
    %c0_i32_1 = arith.constant 0 : i32
    return %arg0, %c0_i32, %c0_i32_0 : i32, i32, i32
  }
}

</mosaic_0001>

<bundles_post_ra>
// kernel: weight_norm_conv2d.1
= control target key start
LH: loop header
LB: loop body
LE: loop exit
PB: predicated region body
PF: predicated region fallthrough
CT: control target
= control target key end

     0   :  { %s2068_s12 = smov 0   ;;  %s2070_s13 = smov 0   ;;  %s2238_s0 = inlined_call_operand.vmem [shape: f32[2,4,342], index: 0, kind: input, shape index: {}]   ;;  %s2239_s1 = inlined_call_operand.vmem [shape: f32[9,8,4], index: 1, kind: input, shape index: {}]   ;;  %s2240_s2 = inlined_call_operand.vmem [shape: f32[8,1], index: 2, kind: input, shape index: {}]   ;;  %s2241_s3 = inlined_call_operand.vmem [shape: f32[2,8,288], index: 3, kind: output, shape index: {}]  }
   0x1   :  { %s2072_s14 = smov 0  }
   0x2 LB: > { %s25_s15 = sadd.s32 1, %s2031_s13  ;;  %p1853_p0 = scmp.ge.s32.totalorder %s2035_s14, 1  ;;  %s2035_s14 = sphi %s2072_s14, %s13_s14   ;;  %s2031_s13 = sphi %s2070_s13, %s2243_s13   ;;  %s2027_s12 = sphi %s2068_s12, %s2242_s12  }
   0x3   : > { %p27_p1 = scmp.ge.s32.totalorder %s25_s15, 2  ;;  %p164_p2 = scmp.lt.s32.totalorder %s2035_s14, 3 }
   0x5   : > { %s2245_s15 = smov (%p27_p1, %s25_s15), 0  ;;  %p165_p3 = pnand %p1853_p0, %p164_p2 }
   0x6   : > { %p196_p4 = scmp.lt.s32.totalorder (!%p165_p3), %s2027_s12, 1  ;;  %s2039_s20 = smov (!%p165_p3), 127  }
   0x7   : > { %168 = sbr.rel (%p165_p3) target bundleno = 383 (0x17f), region = 32  ;;  %s2040_s23 = smov (!%p165_p3), 126  }
   0x8   : > { %s2041_s24 = smov (!%p165_p3), 110   ;;  %s2042_s25 = smov (!%p165_p3), 109  }
   0x9   : > { %s2043_s26 = smov (!%p165_p3), 108   ;;  %s2044_s27 = smov (!%p165_p3), 92  }
   0xa   : > { %s2046_s28 = smov (!%p165_p3), 91   ;;  %s2047_s29 = smov (!%p165_p3), 90  }
   0xc   : > { %v2037_v0 = vmov 0.0   ;;  %vm2038_vm0 = vmmov 0   ;;  %s2247_s12 = smov (!%p196_p4, %s2027_s12), 1  ;;  %vm235_vm1 = vcmask 1043456   ;;  %v227_v6 = vld [vmem:[%s2239_s1] sm:$0xff]  ;;  %vm231_vm2 = vcmask 31744  }
   0xd   : > { %1929 = vmatprep.subr.mxu1 %v2037_v0  ;;  %1931 = vmatprep.mubr.msk.f32.mxu1 %vm2038_vm0, %v2037_v0  ;;  %s1974_s16 = smul.u32 12, %s2247_s12  ;;  %v2045_v12 = vmov 0   ;;  %v1748_v14 = vld [vmem:[%s2240_s2] sm:$0xff]  ;;  %vm220_vm3 = vcmask 261120   ;;  %v1861_v15 = vld [vmem:[%s2239_s1 + $0x8] sm:$0xff]  ;;  %v1867_v18 = vld [vmem:[%s2239_s1 + $0x10] sm:$0xff] }
   0xe   : > { %306 = vmatprep.mubr.f32.mxu0 %v2037_v0  ;;  %2011 = vset.pattern.permute.xlu0 %v2045_v12  ;;  %221 = vst.msk [vmem:[#allocation2 + $0x10] sm:$0xff] %vm220_vm3, %v2037_v0  ;;  %vm399_vm4 = vcmask 1039360   ;;  %vm568_vm5 = vcmask 1031168   ;;  %vm737_vm6 = vcmask 900096   ;;  %v1873_v29 = vld [vmem:[%s2239_s1 + $0x18] sm:$0xff]  ;;  %vm906_vm7 = vcmask 891904  }
   0xf   : > { %s2096_s19 = scalar_lea.vmem %s2238_s0, %s1974_s16  ;;  %v1879_v36 = vld [vmem:[%s2239_s1 + $0x20] sm:$0xff]  ;;  %vm1075_vm8 = vcmask 883712   ;;  %v1885_v41 = vld [vmem:[%s2239_s1 + $0x28] sm:$0xff]  ;;  %vm1244_vm9 = vcmask 752640   ;;  %v1891_v46 = vld [vmem:[%s2239_s1 + $0x30] sm:$0xff]  ;;  %vm1413_vm10 = vcmask 744448  }
  0x10   : > { %v387_v1 = vld [vmem:[%s2096_s19 + $0x8] sm:$0xf]  ;;  %v386_v2 = vld [vmem:[%s2096_s19] sm:$0xff]  ;;  %v1897_v51 = vld [vmem:[%s2239_s1 + $0x38] sm:$0xff]  ;;  %vm1582_vm11 = vcmask 736256  }
  0x11   : > { %397 = vrot.lane.b32.xlu0 %v387_v1, %s2039_s20  ;;  %393 = vrot.lane.b32.xlu1 %v386_v2, %s2039_s20  ;;  %v392_v3 = vcombine.high %v386_v2, %v386_v2  ;;  %v556_v4 = vld [vmem:[%s2096_s19 + $0x8] sm:$0xf]  ;;  %v1903_v58 = vld [vmem:[%s2239_s1 + $0x40] sm:$0xff] }
  0x12   : > { %v226_v5 = vld [vmem:[%s2096_s19 + $0x8] sm:$0xf] }
  0x13   : > { %1856 = vmatprep.subr.msk.mxu0 %vm235_vm1, %v392_v3  ;;  %1930 = vmatpush3.msk.msra.mxu1 %vm235_vm1, %v226_v5  ;;  %v725_v7 = vld [vmem:[%s2096_s19 + $0x8] sm:$0xf] }
  0x14   : > { %1857 = vmatpush1.msk.msra.mxu0 %vm235_vm1, %v386_v2  ;;  %1934 = vmatprep.subr.mxu1 %v2037_v0  ;;  %v894_v8 = vld [vmem:[%s2096_s19 + $0x8] sm:$0xf] }
  0x15   : > { %566 = vrot.lane.b32.xlu0 %v556_v4, %s2040_s23  ;;  %562 = vrot.lane.b32.xlu1 %v386_v2, %s2040_s23  ;;  %v1063_v9 = vld [vmem:[%s2096_s19 + $0x8] sm:$0xf] }
  0x16   : > { %1932 = vmatmul.mubr.msk.f32.vlgmr.msra.gmra.mxu1 %vm231_vm2, %v227_v6  ;;  %1858 = vmatmul.mubr.msk.f32.vlgmr.msra.gmra.mxu0 %vm231_vm2, %v227_v6  ;;  %v1232_v10 = vld [vmem:[%s2096_s19 + $0x8] sm:$0xf] }
  0x17   : > { %1936 = vmatprep.mubr.msk.f32.mxu1 %vm2038_vm0, %v2037_v0  ;;  %475 = vmatprep.mubr.f32.mxu0 %v2037_v0  ;;  %v1401_v11 = vld [vmem:[%s2096_s19 + $0x8] sm:$0xf] }
  0x18   : > { %v1570_v13 = vld [vmem:[%s2096_s19 + $0x8] sm:$0xf] }
  0x19   : > { %564 = vrot.lane.b32.xlu1 %v392_v3, %s2040_s23  ;;  %395 = vrot.lane.b32.xlu0 %v392_v3, %s2039_s20 }
  0x1d   : > { %735 = vrot.lane.b32.xlu1 %v725_v7, %s2041_s24  ;;  %733 = vrot.lane.b32.xlu0 %v392_v3, %s2041_s24 }
  0x21   : > { %902 = vrot.lane.b32.xlu1 %v392_v3, %s2042_s25  ;;  %731 = vrot.lane.b32.xlu0 %v386_v2, %s2041_s24 }
  0x25   : > { %900 = vrot.lane.b32.xlu1 %v386_v2, %s2042_s25  ;;  %904 = vrot.lane.b32.xlu0 %v894_v8, %s2042_s25  ;;  %s1975_s25 = smul.u32 24, %s2247_s12 }
  0x29   : > { %1073 = vrot.lane.b32.xlu1 %v1063_v9, %s2043_s26  ;;  %1071 = vrot.lane.b32.xlu0 %v392_v3, %s2043_s26 }
  0x2d   : > { %1240 = vrot.lane.b32.xlu1 %v392_v3, %s2044_s27  ;;  %1069 = vrot.lane.b32.xlu0 %v386_v2, %s2043_s26 }
  0x31   : > { %1238 = vrot.lane.b32.xlu1 %v386_v2, %s2044_s27  ;;  %1242 = vrot.lane.b32.xlu0 %v1232_v10, %s2044_s27 }
  0x35   : > { %1411 = vrot.lane.b32.xlu1 %v1401_v11, %s2046_s28  ;;  %1409 = vrot.lane.b32.xlu0 %v392_v3, %s2046_s28 }
  0x39   : > { %1578 = vrot.lane.b32.xlu1 %v392_v3, %s2047_s29  ;;  %1407 = vrot.lane.b32.xlu0 %v386_v2, %s2046_s28  ;;  %s213_s28 = scalar_lea.vmem %s2241_s3, %s1975_s25 }
  0x3d   : > { %1576 = vrot.lane.b32.xlu1 %v386_v2, %s2047_s29  ;;  %1580 = vrot.lane.b32.xlu0 %v1570_v13, %s2047_s29  ;;  %v224_v13 = vld [vmem:[#allocation2 + $0x10] sm:$0xff] }
  0x41   : > { %1751 = vperm.xlu0 %2011, %v1748_v14  }
  0x83   : > { %v398_v16 = vpop.permute.xlu0 %397  ;;  %v394_v17 = vpop.permute.xlu1 %393 }
  0x84   : > { %1935 = vmatpush3.msk.msra.mxu1 %vm235_vm1, %v398_v16 }
  0x85   : > { %1939 = vmatprep.subr.mxu1 %v2037_v0  ;;  %1937 = vmatmul.mubr.msk.f32.vlgmr.msra.gmra.mxu1 %vm231_vm2, %v1861_v15 }
  0x86   : > { %1941 = vmatprep.mubr.msk.f32.mxu1 %vm2038_vm0, %v2037_v0 }
  0x87   : > { %v567_v19 = vpop.permute.xlu0 %566  ;;  %v563_v20 = vpop.permute.xlu1 %562 }
  0x88   : > { %1940 = vmatpush3.msk.msra.mxu1 %vm235_vm1, %v567_v19 }
  0x89   : > { %1944 = vmatprep.subr.mxu1 %v2037_v0  ;;  %1942 = vmatmul.mubr.msk.f32.vlgmr.msra.gmra.mxu1 %vm231_vm2, %v1867_v18 }
  0x8a   : > { %1946 = vmatprep.mubr.msk.f32.mxu1 %vm2038_vm0, %v2037_v0 }
  0x8b   : > { %v565_v21 = vpop.permute.xlu1 %564  ;;  %v396_v22 = vpop.permute.xlu0 %395 }
  0x8c   : > { %v400_v23 = vsel %vm399_vm4, %v394_v17, %v396_v22  ;;  %v401_v24 = vsel %vm399_vm4, %v396_v22, %v398_v16  ;;  %v570_v25 = vsel %vm568_vm5, %v565_v21, %v567_v19  ;;  %v569_v26 = vsel %vm568_vm5, %v563_v20, %v565_v21 }
  0x8d   : > { %1862 = vmatprep.subr.msk.mxu0 %vm235_vm1, %v401_v24 }
  0x8e   : > { %1863 = vmatpush1.msk.msra.mxu0 %vm235_vm1, %v400_v23 }
  0x8f   : > { %v736_v27 = vpop.permute.xlu1 %735  ;;  %v734_v28 = vpop.permute.xlu0 %733  ;;  %1868 = vmatprep.subr.msk.mxu0 %vm235_vm1, %v570_v25  ;;  %1864 = vmatmul.mubr.msk.f32.vlgmr.msra.gmra.mxu0 %vm231_vm2, %v1861_v15 }
  0x90   : > { %v739_v30 = vsel %vm737_vm6, %v734_v28, %v736_v27  ;;  %1869 = vmatpush1.msk.msra.mxu0 %vm235_vm1, %v569_v26  ;;  %1945 = vmatpush3.msk.msra.mxu1 %vm235_vm1, %v736_v27 }
  0x91   : > { %1874 = vmatprep.subr.msk.mxu0 %vm235_vm1, %v739_v30  ;;  %644 = vmatprep.mubr.f32.mxu0 %v2037_v0 }
  0x92   : > { %1949 = vmatprep.subr.mxu1 %v2037_v0  ;;  %1947 = vmatmul.mubr.msk.f32.vlgmr.msra.gmra.mxu1 %vm231_vm2, %v1873_v29 }
  0x93   : > { %v903_v31 = vpop.permute.xlu1 %902  ;;  %v732_v32 = vpop.permute.xlu0 %731  ;;  %1870 = vmatmul.mubr.msk.f32.vlgmr.msra.gmra.mxu0 %vm231_vm2, %v1867_v18  ;;  %1951 = vmatprep.mubr.msk.f32.mxu1 %vm2038_vm0, %v2037_v0 }
  0x94   : > { %v738_v33 = vsel %vm737_vm6, %v732_v32, %v734_v28  ;;  %813 = vmatprep.mubr.f32.mxu0 %v2037_v0 }
  0x95   : > { %1875 = vmatpush1.msk.msra.mxu0 %vm235_vm1, %v738_v33 }
  0x97   : > { %v901_v34 = vpop.permute.xlu1 %900  ;;  %v905_v35 = vpop.permute.xlu0 %904  ;;  %1876 = vmatmul.mubr.msk.f32.vlgmr.msra.gmra.mxu0 %vm231_vm2, %v1873_v29 }
  0x98   : > { %v907_v37 = vsel %vm906_vm7, %v901_v34, %v903_v31  ;;  %v908_v38 = vsel %vm906_vm7, %v903_v31, %v905_v35  ;;  %1950 = vmatpush3.msk.msra.mxu1 %vm235_vm1, %v905_v35  ;;  %982 = vmatprep.mubr.f32.mxu0 %v2037_v0 }
  0x99   : > { %1880 = vmatprep.subr.msk.mxu0 %vm235_vm1, %v908_v38  ;;  %1954 = vmatprep.subr.mxu1 %v2037_v0 }
  0x9a   : > { %1881 = vmatpush1.msk.msra.mxu0 %vm235_vm1, %v907_v37  ;;  %1952 = vmatmul.mubr.msk.f32.vlgmr.msra.gmra.mxu1 %vm231_vm2, %v1879_v36 }
  0x9b   : > { %v1074_v39 = vpop.permute.xlu1 %1073  ;;  %v1072_v40 = vpop.permute.xlu0 %1071  ;;  %1882 = vmatmul.mubr.msk.f32.vlgmr.msra.gmra.mxu0 %vm231_vm2, %v1879_v36  ;;  %1956 = vmatprep.mubr.msk.f32.mxu1 %vm2038_vm0, %v2037_v0 }
  0x9c   : > { %v1077_v42 = vsel %vm1075_vm8, %v1072_v40, %v1074_v39  ;;  %1955 = vmatpush3.msk.msra.mxu1 %vm235_vm1, %v1074_v39  ;;  %1151 = vmatprep.mubr.f32.mxu0 %v2037_v0 }
  0x9d   : > { %1886 = vmatprep.subr.msk.mxu0 %vm235_vm1, %v1077_v42  ;;  %1959 = vmatprep.subr.mxu1 %v2037_v0 }
  0x9e   : > { %1957 = vmatmul.mubr.msk.f32.vlgmr.msra.gmra.mxu1 %vm231_vm2, %v1885_v41 }
  0x9f   : > { %v1241_v43 = vpop.permute.xlu1 %1240  ;;  %v1070_v44 = vpop.permute.xlu0 %1069  ;;  %1961 = vmatprep.mubr.msk.f32.mxu1 %vm2038_vm0, %v2037_v0 }
  0xa0   : > { %v1076_v45 = vsel %vm1075_vm8, %v1070_v44, %v1072_v40 }
  0xa1   : > { %1887 = vmatpush1.msk.msra.mxu0 %vm235_vm1, %v1076_v45 }
  0xa2   : > { %1888 = vmatmul.mubr.msk.f32.vlgmr.msra.gmra.mxu0 %vm231_vm2, %v1885_v41 }
  0xa3   : > { %v1239_v47 = vpop.permute.xlu1 %1238  ;;  %v1243_v48 = vpop.permute.xlu0 %1242  ;;  %1320 = vmatprep.mubr.f32.mxu0 %v2037_v0 }
  0xa4   : > { %v1245_v49 = vsel %vm1244_vm9, %v1239_v47, %v1241_v43  ;;  %v1246_v50 = vsel %vm1244_vm9, %v1241_v43, %v1243_v48  ;;  %1960 = vmatpush3.msk.msra.mxu1 %vm235_vm1, %v1243_v48 }
  0xa5   : > { %1892 = vmatprep.subr.msk.mxu0 %vm235_vm1, %v1246_v50  ;;  %1962 = vmatmul.mubr.msk.f32.vlgmr.msra.gmra.mxu1 %vm231_vm2, %v1891_v46 }
  0xa6   : > { %1893 = vmatpush1.msk.msra.mxu0 %vm235_vm1, %v1245_v49  ;;  %1964 = vmatprep.subr.mxu1 %v2037_v0 }
  0xa7   : > { %v1412_v52 = vpop.permute.xlu1 %1411  ;;  %v1410_v53 = vpop.permute.xlu0 %1409  ;;  %1894 = vmatmul.mubr.msk.f32.vlgmr.msra.gmra.mxu0 %vm231_vm2, %v1891_v46  ;;  %1966 = vmatprep.mubr.msk.f32.mxu1 %vm2038_vm0, %v2037_v0 }
  0xa8   : > { %v1415_v54 = vsel %vm1413_vm10, %v1410_v53, %v1412_v52  ;;  %1965 = vmatpush3.msk.msra.mxu1 %vm235_vm1, %v1412_v52  ;;  %1489 = vmatprep.mubr.f32.mxu0 %v2037_v0 }
  0xa9   : > { %1898 = vmatprep.subr.msk.mxu0 %vm235_vm1, %v1415_v54  ;;  %1967 = vmatmul.mubr.msk.f32.vlgmr.msra.gmra.mxu1 %vm231_vm2, %v1897_v51 }
  0xaa   : > { %1969 = vmatprep.subr.mxu1 %v2037_v0  ;;  %1971 = vmatprep.mubr.msk.f32.mxu1 %vm2038_vm0, %v2037_v0 }
  0xab   : > { %v1579_v55 = vpop.permute.xlu1 %1578  ;;  %v1408_v56 = vpop.permute.xlu0 %1407 }
  0xac   : > { %v1414_v57 = vsel %vm1413_vm10, %v1408_v56, %v1410_v53 }
  0xad   : > { %1899 = vmatpush1.msk.msra.mxu0 %vm235_vm1, %v1414_v57 }
  0xae   : > { %1900 = vmatmul.mubr.msk.f32.vlgmr.msra.gmra.mxu0 %vm231_vm2, %v1897_v51 }
  0xaf   : > { %v1577_v59 = vpop.permute.xlu1 %1576  ;;  %v1581_v60 = vpop.permute.xlu0 %1580  ;;  %1658 = vmatprep.mubr.f32.mxu0 %v2037_v0 }
  0xb0   : > { %v1583_v61 = vsel %vm1582_vm11, %v1577_v59, %v1579_v55  ;;  %v1584_v62 = vsel %vm1582_vm11, %v1579_v55, %v1581_v60  ;;  %1970 = vmatpush3.msk.msra.mxu1 %vm235_vm1, %v1581_v60 }
  0xb1   : > { %1904 = vmatprep.subr.msk.mxu0 %vm235_vm1, %v1584_v62  ;;  %1972 = vmatmul.mubr.msk.f32.vlgmr.msra.gmra.mxu1 %vm231_vm2, %v1903_v58 }
  0xb2   : > { %1905 = vmatpush1.msk.msra.mxu0 %vm235_vm1, %v1583_v61 }
  0xb3   : > { %1906 = vmatmul.mubr.msk.f32.vlgmr.msra.gmra.mxu0 %vm231_vm2, %v1903_v58 }
  0xbc   : > { %v1752_v55 = vpop.permute.xlu0 %1751 }
  0xd6   : > { %v379_v63 = vpop.f32.mrf.mxu1  ;;  %v308_v3 = vpop.f32.mrf.mxu0 }
  0xd7   : > { %v385_v16 = vadd.f32 %v379_v63, %v224_v13 }
  0xd8   : > { %v1933_v1 = vpop.f32.mrf.mxu1  ;;  %v310_v6 = vpop.f32.mrf.mxu0 }
 0x145   : > { %v548_v2 = vpop.f32.mrf.mxu1 }
 0x146   : > { %v554_v21 = vadd.f32 %v548_v2, %v385_v16 }
 0x147   : > { %v1938_v4 = vpop.f32.mrf.mxu1 }
 0x149   : > { %v717_v5 = vpop.f32.mrf.mxu1 }
 0x14a   : > { %v723_v27 = vadd.f32 %v717_v5, %v554_v21 }
 0x14b   : > { %v1943_v0 = vpop.f32.mrf.mxu1 }
 0x14f   : > { %v477_v7 = vpop.f32.mrf.mxu0 }
 0x150   : > { %v552_v20 = vadd.f32 %v477_v7, %v308_v3 }
 0x151   : > { %v479_v8 = vpop.f32.mrf.mxu0 }
 0x152   : > { %v886_v9 = vpop.f32.mrf.mxu1  ;;  %v553_v25 = vadd.f32 %v479_v8, %v310_v6 }
 0x153   : > { %v646_v10 = vpop.f32.mrf.mxu0  ;;  %v892_v33 = vadd.f32 %v886_v9, %v723_v27 }
 0x154   : > { %v1948_v11 = vpop.f32.mrf.mxu1  ;;  %v721_v26 = vadd.f32 %v646_v10, %v552_v20 }
 0x155   : > { %v648_v12 = vpop.f32.mrf.mxu0 }
 0x156   : > { %v722_v31 = vadd.f32 %v648_v12, %v553_v25 }
 0x157   : > { %v815_v14 = vpop.f32.mrf.mxu0 }
 0x158   : > { %v890_v32 = vadd.f32 %v815_v14, %v721_v26 }
 0x159   : > { %v817_v15 = vpop.f32.mrf.mxu0 }
 0x15a   : > { %v1055_v17 = vpop.f32.mrf.mxu1  ;;  %v891_v37 = vadd.f32 %v817_v15, %v722_v31 }
 0x15b   : > { %v984_v18 = vpop.f32.mrf.mxu0  ;;  %v1061_v39 = vadd.f32 %v1055_v17, %v892_v33 }
 0x15c   : > { %v1953_v19 = vpop.f32.mrf.mxu1  ;;  %v1059_v38 = vadd.f32 %v984_v18, %v890_v32 }
 0x15d   : > { %v986_v22 = vpop.f32.mrf.mxu0 }
 0x15e   : > { %v1224_v23 = vpop.f32.mrf.mxu1  ;;  %v1060_v43 = vadd.f32 %v986_v22, %v891_v37 }
 0x15f   : > { %v1230_v41 = vadd.f32 %v1224_v23, %v1061_v39 }
 0x160   : > { %v1958_v24 = vpop.f32.mrf.mxu1 }
 0x162   : > { %v1153_v28 = vpop.f32.mrf.mxu0 }
 0x163   : > { %v1228_v44 = vadd.f32 %v1153_v28, %v1059_v38 }
 0x164   : > { %v1155_v29 = vpop.f32.mrf.mxu0 }
 0x165   : > { %v1393_v30 = vpop.f32.mrf.mxu1  ;;  %v1229_v47 = vadd.f32 %v1155_v29, %v1060_v43 }
 0x166   : > { %v1399_v45 = vadd.f32 %v1393_v30, %v1230_v41 }
 0x167   : > { %v1963_v34 = vpop.f32.mrf.mxu1  ;;  %v1322_v35 = vpop.f32.mrf.mxu0 }
 0x168   : > { %v1397_v48 = vadd.f32 %v1322_v35, %v1228_v44 }
 0x169   : > { %v1562_v36 = vpop.f32.mrf.mxu1  ;;  %v1324_v42 = vpop.f32.mrf.mxu0 }
 0x16a   : > { %v1568_v49 = vadd.f32 %v1562_v36, %v1399_v45  ;;  %v1398_v52 = vadd.f32 %v1324_v42, %v1229_v47 }
 0x16b   : > { %v1968_v40 = vpop.f32.mrf.mxu1 }
 0x16e   : > { %v1491_v46 = vpop.f32.mrf.mxu0 }
 0x16f   : > { %v1566_v53 = vadd.f32 %v1491_v46, %v1397_v48 }
 0x170   : > { %v1493_v50 = vpop.f32.mrf.mxu0 }
 0x171   : > { %v1731_v51 = vpop.f32.mrf.mxu1  ;;  %v1567_v58 = vadd.f32 %v1493_v50, %v1398_v52 }
 0x172   : > { %v1737_v54 = vadd.f32 %v1731_v51, %v1568_v49 }
 0x173   : > { %v1660_v56 = vpop.f32.mrf.mxu0  ;;  %v1973_v57 = vpop.f32.mrf.mxu1 }
 0x174   : > { %1741 = vst.msk [vmem:[#allocation2 + $0x10] sm:$0xff] %vm220_vm3, %v1737_v54  ;;  %v1735_v59 = vadd.f32 %v1660_v56, %v1566_v53 }
 0x175   : > { %v1662_v60 = vpop.f32.mrf.mxu0 }
 0x176   : > { %v1736_v61 = vadd.f32 %v1662_v60, %v1567_v58  ;;  %v1754_v62 = vadd.f32 %v1752_v55, %v1735_v59 }
 0x178   : > { %v1755_v63 = vadd.f32 %v1752_v55, %v1736_v61  ;;  %1757 = vst [vmem:[%s213_s28] sm:$0xff] %v1754_v62 }
 0x17a   : > { %1758 = vst [vmem:[%s213_s28 + $0x8] sm:$0xff] %v1755_v63 }
 0x17b   : > { %v1747_v1 = vld [vmem:[#allocation2 + $0x10] sm:$0xff] }
 0x17c   : > { %v1756_v2 = vadd.f32 %v1752_v55, %v1747_v1 }
 0x17e   : > { %1759 = vst.msk [vmem:[%s213_s28 + $0x10] sm:$0xff] %vm220_vm3, %v1756_v2 }
 0x17f PF: > { %s13_s14 = sadd.s32 1, %s2035_s14   ;;  %s2242_s12 = smov %s2031_s13 }
 0x180   : > { %p10_p5 = scmp.ge.s32.totalorder %s13_s14, 4   ;;  %s2243_s13 = smov %s2245_s15 }
 0x182   :  { %12 = sbr.rel (!%p10_p5) target bundleno = 2 (0x2), region = 81 }

</bundles_post_ra>
